<compile_context>
chip_gen: v7x
topology: tpu7x:2x2x1
jax: 0.10.0
libtpu: 0.0.40
codegen_flags: <defaults>
</compile_context>

<pallas_src>
import functools

import jax
import jax.numpy as jnp
import numpy as np
from jax import lax
from jax.experimental import pallas as pl
from jax.experimental.pallas import tpu as pltpu

K = 3  # kernel size


def _pick_spatial_tile(total, target=128):
    """Largest multiple of 128 that divides `total` and is <= target, else `total`."""
    best = None
    t = 128
    while t <= min(total, target):
        if total % t == 0:
            best = t
        t += 128
    return best if best is not None else total


# --------------------------------------------------------------------------
# Kernel A: subpixel transposed-conv (single matmul) + bias + ReLU
#           + masking of out-of-range parity positions
#           + per-image batch-norm statistics (sum, sum of squares).
# Block shapes: x (1, 4*Cin, tS), w (4*Cout, 4*Cin), b (4*Cout, 1),
#               gmask (4*Cout, 2), posbad (2, tS),
#               h (1, 4*Cout, tS), stats (1, 4*Cout, 1).
# --------------------------------------------------------------------------
def _convt_relu_stats_kernel(x_ref, w_ref, b_ref, gm_ref, pb_ref,
                             h_ref, sum_ref, ssq_ref):
    s = pl.program_id(1)  # spatial-strip axis ("arbitrary": stats accumulate over it)

    @pl.when(s == 0)
    def _():
        sum_ref[...] = jnp.zeros_like(sum_ref)
        ssq_ref[...] = jnp.zeros_like(ssq_ref)

    # One MXU matmul: (4*Cout, 4*Cin) @ (4*Cin, tS) -> (4*Cout, tS)
    acc = jnp.dot(w_ref[...], x_ref[0], preferred_element_type=jnp.float32)
    acc = acc + b_ref[...]                      # (4*Cout, 1) broadcast over lanes
    acc = jnp.maximum(acc, 0.0)                 # ReLU

    # Zero the parity positions that fall outside (Hout, Wout):
    #   odd-row groups at the last patch row, odd-col groups at the last patch column.
    # keep = NOT(dy1 & lastrow) AND NOT(dx1 & lastcol), built from rank-1 factors
    # (sublane vector x lane vector) -> pure VPU broadcasts, no relayout.
    keep = (1.0 - gm_ref[:, 0:1] * pb_ref[0:1, :]) * \
           (1.0 - gm_ref[:, 1:2] * pb_ref[1:2, :])
    acc = acc * keep

    h_ref[0] = acc
    sum_ref[0] += jnp.sum(acc, axis=1, keepdims=True)       # masked elems contribute 0
    ssq_ref[0] += jnp.sum(acc * acc, axis=1, keepdims=True)


# --------------------------------------------------------------------------
# Kernel B: batch-norm application (per-channel scale/shift), in place.
# --------------------------------------------------------------------------
def _bn_apply_kernel(h_ref, scale_ref, shift_ref, o_ref):
    o_ref[0] = h_ref[0] * scale_ref[...] + shift_ref[...]


def conv_transpose_block(x_nchw, weight_pt, bias, gamma, beta, *,
                         stride=2, eps=1e-5, spatial_tile=128):
    """x_nchw: (N, Cin, H, W) f32;  weight_pt: (Cin, Cout, 3, 3) (PyTorch layout)."""
    assert stride == 2, "subpixel decomposition implemented for stride=2"
    N, Cin, H, W = x_nchw.shape
    Cout = weight_pt.shape[1]
    Hout, Wout = 2 * H - 1, 2 * W - 1
    HW = H * W
    C4i, C4o = 4 * Cin, 4 * Cout
    f32 = jnp.float32

    x = x_nchw.astype(f32)

    # ---- 2x2-neighbour im2col of the ORIGINAL input (no zero-upsample),
    #      channels-first so the flattened spatial dim sits in lanes: (N, 4*Cin, H*W).
    xpad = jnp.pad(x, ((0, 0), (0, 0), (0, 1), (0, 1)))       # pad bottom/right by 1
    patches = jnp.concatenate(
        [xpad[:, :, i:i + H, j:j + W] for i in (0, 1) for j in (0, 1)], axis=1
    ).reshape(N, C4i, HW)

    # ---- weight: one (4*Cout, 4*Cin) matrix computing all 4 output parities at once.
    # out index = (2*dy + dx)*Cout + co ; in index = (2*i + j)*Cin + ci
    # (parity dy, row-offset i) -> kernel tap kh :  (0,0)->1, (1,0)->2, (1,1)->0, (0,1) unused
    ktap = {(0, 0): 1, (1, 0): 2, (1, 1): 0}
    wt = jnp.zeros((2, 2, Cout, 2, 2, Cin), f32)
    for dy in (0, 1):
        for dx in (0, 1):
            for i in (0, 1):
                for j in (0, 1):
                    if (dy, i) in ktap and (dx, j) in ktap:
                        tap = weight_pt[:, :, ktap[(dy, i)], ktap[(dx, j)]]  # (Cin, Cout)
                        wt = wt.at[dy, dx, :, i, j, :].set(tap.T.astype(f32))
    wbig = wt.reshape(C4o, C4i)

    bias_big = jnp.tile(bias.astype(f32), 4).reshape(C4o, 1)

    # ---- validity-mask factors (built from static shapes; compile-time constants).
    g = np.arange(C4o) // Cout
    gmask = jnp.asarray(np.stack([(g // 2 == 1), (g % 2 == 1)],
                                 axis=1).astype(np.float32))            # (4*Cout, 2)
    idx = np.arange(HW)
    posbad = jnp.asarray(np.stack([(idx // W == H - 1), (idx % W == W - 1)],
                                  axis=0).astype(np.float32))           # (2, H*W)

    tS = _pick_spatial_tile(HW, spatial_tile)
    nS = HW // tS

    # ---- kernel A: conv-transpose + ReLU + per-image BN statistics ----------------
    h, psum, pssq = pl.pallas_call(
        _convt_relu_stats_kernel,
        out_shape=(jax.ShapeDtypeStruct((N, C4o, HW), f32),
                   jax.ShapeDtypeStruct((N, C4o, 1), f32),
                   jax.ShapeDtypeStruct((N, C4o, 1), f32)),
        grid_spec=pltpu.PrefetchScalarGridSpec(
            num_scalar_prefetch=0,
            grid=(N, nS),
            in_specs=[
                pl.BlockSpec((1, C4i, tS), lambda n, s: (n, 0, s)),
                pl.BlockSpec((C4o, C4i), lambda n, s: (0, 0)),   # resident weight
                pl.BlockSpec((C4o, 1), lambda n, s: (0, 0)),     # resident bias
                pl.BlockSpec((C4o, 2), lambda n, s: (0, 0)),     # resident group mask
                pl.BlockSpec((2, tS), lambda n, s: (0, s)),      # position mask strip
            ],
            out_specs=[
                pl.BlockSpec((1, C4o, tS), lambda n, s: (n, 0, s)),
                pl.BlockSpec((1, C4o, 1), lambda n, s: (n, 0, 0)),  # per-n partial sums
                pl.BlockSpec((1, C4o, 1), lambda n, s: (n, 0, 0)),  # per-n partial ssq
            ],
        ),
        compiler_params=pltpu.CompilerParams(
            dimension_semantics=("parallel", "arbitrary"),
            vmem_limit_bytes=32 * 1024 * 1024),
    )(patches, wbig, bias_big, gmask, posbad)

    # ---- tiny per-channel statistics math (training-mode BN, biased variance) -----
    count = jnp.float32(N * Hout * Wout)
    ch_sum = psum.reshape(N, 4, Cout).sum(axis=(0, 1))
    ch_ssq = pssq.reshape(N, 4, Cout).sum(axis=(0, 1))
    mean = ch_sum / count
    var = jnp.maximum(ch_ssq / count - mean * mean, 0.0)   # clamp guards cancellation
    scale = gamma.astype(f32) * lax.rsqrt(var + eps)
    shift = beta.astype(f32) - mean * scale
    scale_big = jnp.tile(scale, 4).reshape(C4o, 1)
    shift_big = jnp.tile(shift, 4).reshape(C4o, 1)

    # ---- kernel B: BN apply, lane-dense tiles, in place over h ---------------------
    hbn = pl.pallas_call(
        _bn_apply_kernel,
        out_shape=jax.ShapeDtypeStruct((N, C4o, HW), f32),
        grid_spec=pltpu.PrefetchScalarGridSpec(
            num_scalar_prefetch=0,
            grid=(N, nS),
            in_specs=[
                pl.BlockSpec((1, C4o, tS), lambda n, s: (n, 0, s)),
                pl.BlockSpec((C4o, 1), lambda n, s: (0, 0)),
                pl.BlockSpec((C4o, 1), lambda n, s: (0, 0)),
            ],
            out_specs=pl.BlockSpec((1, C4o, tS), lambda n, s: (n, 0, s)),
        ),
        input_output_aliases={0: 0},
        compiler_params=pltpu.CompilerParams(
            dimension_semantics=("parallel", "parallel"),
            vmem_limit_bytes=32 * 1024 * 1024),
    )(h, scale_big, shift_big)

    # ---- parity interleave -> final NCHW output (single fused XLA transpose) ------
    y = hbn.reshape(N, 2, 2, Cout, H, W)                 # (n, dy, dx, co, r, c)
    y = jnp.transpose(y, (0, 3, 4, 1, 5, 2))             # (n, co, r, dy, c, dx)
    y = y.reshape(N, Cout, 2 * H, 2 * W)[:, :, :Hout, :Wout]
    return y


# --------------------------------------------------------------------------
# Pure-JAX (XLA) reference for sanity checking the Pallas pipeline.
# --------------------------------------------------------------------------
def reference(x_nchw, weight_pt, bias, gamma, beta, stride, eps=1e-5):
    w_flip = jnp.transpose(jnp.flip(weight_pt, axis=(2, 3)), (1, 0, 2, 3))  # (Cout,Cin,3,3)
    y = lax.conv_general_dilated(
        x_nchw, w_flip, window_strides=(1, 1),
        padding=((1, 1), (1, 1)), lhs_dilation=(stride, stride),
        dimension_numbers=("NCHW", "OIHW", "NCHW"))
    y = y + bias[None, :, None, None]
    y = jnp.maximum(y, 0.0)
    mean = jnp.mean(y, axis=(0, 2, 3), keepdims=True)
    var = jnp.mean((y - mean) ** 2, axis=(0, 2, 3), keepdims=True)
    return (y - mean) * lax.rsqrt(var + eps) * gamma[None, :, None, None] \
        + beta[None, :, None, None]


if __name__ == "__main__":
    N, Cin, H, W = 2, 4, 16, 16
    Cout, stride = 8, 2

    key = jax.random.PRNGKey(0)
    kx, kw, kb = jax.random.split(key, 3)
    x = jax.random.normal(kx, (N, Cin, H, W), jnp.float32)
    # ConvTranspose2d weight shape: (in_channels, out_channels, kH, kW)
    weight = jax.random.normal(kw, (Cin, Cout, K, K), jnp.float32) * 0.1
    bias = jax.random.normal(kb, (Cout,), jnp.float32) * 0.1
    gamma = jnp.ones((Cout,), jnp.float32)     # BatchNorm2d default affine init
    beta = jnp.zeros((Cout,), jnp.float32)

    fwd = jax.jit(conv_transpose_block,
                  static_argnames=("stride", "eps", "spatial_tile"))
    out = jax.block_until_ready(fwd(x, weight, bias, gamma, beta, stride=stride))

    ref = jax.block_until_ready(reference(x, weight, bias, gamma, beta, stride))
    assert out.shape == (N, Cout, (H - 1) * stride + 1, (W - 1) * stride + 1)
    np.testing.assert_allclose(np.asarray(out), np.asarray(ref), rtol=2e-4, atol=2e-4)

    print("KERNEL_OK")
</pallas_src>

<mosaic_0001>
module attributes {stable_mosaic.version = 11 : i64} {
  func.func @_convt_relu_stats_kernel(%arg0: i32, %arg1: i32, %arg2: memref<1x16x128xf32, #tpu.memory_space<vmem>>, %arg3: memref<32x16xf32, #tpu.memory_space<vmem>>, %arg4: memref<32x1xf32, #tpu.memory_space<vmem>>, %arg5: memref<32x2xf32, #tpu.memory_space<vmem>>, %arg6: memref<2x128xf32, #tpu.memory_space<vmem>>, %arg7: memref<1x32x128xf32, #tpu.memory_space<vmem>>, %arg8: memref<1x32x1xf32, #tpu.memory_space<vmem>>, %arg9: memref<1x32x1xf32, #tpu.memory_space<vmem>>) attributes {dimension_semantics = [#tpu.dimension_semantics<parallel>, #tpu.dimension_semantics<arbitrary>], iteration_bounds = array<i64: 2, 2>, scalar_prefetch = 0 : i64, scratch_operands = 0 : i64, tpu.core_type = #tpu.core_type<tc>, window_params = [{transform_indices = @transform_0, window_bounds = array<i64: 1, 16, 128>}, {pipeline_mode = #tpu.pipeline_mode<synchronous>, transform_indices = @transform_1, window_bounds = array<i64: 32, 16>}, {pipeline_mode = #tpu.pipeline_mode<synchronous>, transform_indices = @transform_2, window_bounds = array<i64: 32, 1>}, {pipeline_mode = #tpu.pipeline_mode<synchronous>, transform_indices = @transform_3, window_bounds = array<i64: 32, 2>}, {transform_indices = @transform_4, window_bounds = array<i64: 2, 128>}, {transform_indices = @transform_5, window_bounds = array<i64: 1, 32, 128>}, {transform_indices = @transform_6, window_bounds = array<i64: 1, 32, 1>}, {transform_indices = @transform_7, window_bounds = array<i64: 1, 32, 1>}]} {
    %c0_i32 = arith.constant 0 : i32
    %0 = arith.cmpi eq, %arg1, %c0_i32 : i32
    %1 = arith.extui %0 : i1 to i32
    %c0_i32_0 = arith.constant 0 : i32
    %2 = arith.cmpi ne, %1, %c0_i32_0 : i32
    scf.if %2 {
      %cst_34 = arith.constant 0.000000e+00 : f32
      %48 = vector.broadcast %cst_34 : f32 to vector<1x32x1xf32>
      %c0_35 = arith.constant 0 : index
      %c0_36 = arith.constant 0 : index
      %c0_37 = arith.constant 0 : index
      %49 = vector.load %arg8[%c0_35, %c0_36, %c0_37] : memref<1x32x1xf32, #tpu.memory_space<vmem>>, vector<1x32x1xf32>
      tpu.vector_store %arg8[%c0_35, %c0_36, %c0_37], %48 {strides = array<i32>} : memref<1x32x1xf32, #tpu.memory_space<vmem>>, vector<1x32x1xf32>,
      %cst_38 = arith.constant 0.000000e+00 : f32
      %50 = vector.broadcast %cst_38 : f32 to vector<1x32x1xf32>
      %c0_39 = arith.constant 0 : index
      %c0_40 = arith.constant 0 : index
      %c0_41 = arith.constant 0 : index
      %51 = vector.load %arg9[%c0_39, %c0_40, %c0_41] : memref<1x32x1xf32, #tpu.memory_space<vmem>>, vector<1x32x1xf32>
      tpu.vector_store %arg9[%c0_39, %c0_40, %c0_41], %50 {strides = array<i32>} : memref<1x32x1xf32, #tpu.memory_space<vmem>>, vector<1x32x1xf32>,
    } else {
    }
    %c0 = arith.constant 0 : index
    %c0_1 = arith.constant 0 : index
    %3 = vector.load %arg3[%c0, %c0_1] : memref<32x16xf32, #tpu.memory_space<vmem>>, vector<32x16xf32>
    %c0_2 = arith.constant 0 : index
    %c0_3 = arith.constant 0 : index
    %c0_4 = arith.constant 0 : index
    %4 = vector.load %arg2[%c0_2, %c0_3, %c0_4] : memref<1x16x128xf32, #tpu.memory_space<vmem>>, vector<1x16x128xf32>
    %5 = vector.shape_cast %4 : vector<1x16x128xf32> to vector<16x128xf32>
    %cst = arith.constant dense<0.000000e+00> : vector<32x128xf32>
    %6 = tpu.matmul %3, %5, %cst {dimension_numbers = #tpu.dot_dimension_numbers<[1], [0], [0], [1], [0, 0, 1, 1], [], []>} : vector<32x16xf32>, vector<16x128xf32>, vector<32x128xf32> -> vector<32x128xf32>
    %c0_5 = arith.constant 0 : index
    %c0_6 = arith.constant 0 : index
    %7 = vector.load %arg4[%c0_5, %c0_6] : memref<32x1xf32, #tpu.memory_space<vmem>>, vector<32x1xf32>
    %8 = vector.broadcast %7 : vector<32x1xf32> to vector<32x128xf32>
    %9 = arith.addf %6, %8 : vector<32x128xf32>
    %cst_7 = arith.constant 0.000000e+00 : f32
    %10 = vector.broadcast %cst_7 : f32 to vector<32x128xf32>
    %11 = arith.maximumf %9, %10 : vector<32x128xf32>
    %c0_8 = arith.constant 0 : index
    %c0_9 = arith.constant 0 : index
    %12 = vector.load %arg5[%c0_8, %c0_9] : memref<32x2xf32, #tpu.memory_space<vmem>>, vector<32x1xf32>
    %c0_10 = arith.constant 0 : index
    %c0_11 = arith.constant 0 : index
    %13 = vector.load %arg6[%c0_10, %c0_11] : memref<2x128xf32, #tpu.memory_space<vmem>>, vector<1x128xf32>
    %14 = vector.broadcast %12 : vector<32x1xf32> to vector<32x128xf32>
    %15 = vector.broadcast %13 : vector<1x128xf32> to vector<32x128xf32>
    %16 = arith.mulf %14, %15 : vector<32x128xf32>
    %cst_12 = arith.constant 1.000000e+00 : f32
    %17 = vector.broadcast %cst_12 : f32 to vector<32x128xf32>
    %18 = arith.subf %17, %16 : vector<32x128xf32>
    %c0_13 = arith.constant 0 : index
    %c1 = arith.constant 1 : index
    %19 = vector.load %arg5[%c0_13, %c1] : memref<32x2xf32, #tpu.memory_space<vmem>>, vector<32x1xf32>
    %c1_14 = arith.constant 1 : index
    %c0_15 = arith.constant 0 : index
    %20 = vector.load %arg6[%c1_14, %c0_15] : memref<2x128xf32, #tpu.memory_space<vmem>>, vector<1x128xf32>
    %21 = vector.broadcast %19 : vector<32x1xf32> to vector<32x128xf32>
    %22 = vector.broadcast %20 : vector<1x128xf32> to vector<32x128xf32>
    %23 = arith.mulf %21, %22 : vector<32x128xf32>
    %cst_16 = arith.constant 1.000000e+00 : f32
    %24 = vector.broadcast %cst_16 : f32 to vector<32x128xf32>
    %25 = arith.subf %24, %23 : vector<32x128xf32>
    %26 = arith.mulf %18, %25 : vector<32x128xf32>
    %27 = arith.mulf %11, %26 : vector<32x128xf32>
    %c0_17 = arith.constant 0 : index
    %c0_18 = arith.constant 0 : index
    %c0_19 = arith.constant 0 : index
    %28 = vector.load %arg7[%c0_17, %c0_18, %c0_19] : memref<1x32x128xf32, #tpu.memory_space<vmem>>, vector<1x32x128xf32>
    %29 = vector.shape_cast %28 : vector<1x32x128xf32> to vector<32x128xf32>
    %30 = vector.shape_cast %27 : vector<32x128xf32> to vector<1x32x128xf32>
    tpu.vector_store %arg7[%c0_17, %c0_18, %c0_19], %30 {strides = array<i32>} : memref<1x32x128xf32, #tpu.memory_space<vmem>>, vector<1x32x128xf32>,
    %c0_20 = arith.constant 0 : index
    %c0_21 = arith.constant 0 : index
    %c0_22 = arith.constant 0 : index
    %31 = vector.load %arg8[%c0_20, %c0_21, %c0_22] : memref<1x32x1xf32, #tpu.memory_space<vmem>>, vector<1x32x1xf32>
    %32 = vector.shape_cast %31 : vector<1x32x1xf32> to vector<32x1xf32>
    %cst_23 = arith.constant dense<0.000000e+00> : vector<32xf32>
    %33 = vector.multi_reduction <add>, %27, %cst_23 [1] : vector<32x128xf32> to vector<32xf32>
    %34 = vector.shape_cast %33 : vector<32xf32> to vector<32x1xf32>
    %35 = arith.addf %32, %34 : vector<32x1xf32>
    %c0_24 = arith.constant 0 : index
    %c0_25 = arith.constant 0 : index
    %c0_26 = arith.constant 0 : index
    %36 = vector.load %arg8[%c0_24, %c0_25, %c0_26] : memref<1x32x1xf32, #tpu.memory_space<vmem>>, vector<1x32x1xf32>
    %37 = vector.shape_cast %36 : vector<1x32x1xf32> to vector<32x1xf32>
    %38 = vector.shape_cast %35 : vector<32x1xf32> to vector<1x32x1xf32>
    tpu.vector_store %arg8[%c0_24, %c0_25, %c0_26], %38 {strides = array<i32>} : memref<1x32x1xf32, #tpu.memory_space<vmem>>, vector<1x32x1xf32>,
    %c0_27 = arith.constant 0 : index
    %c0_28 = arith.constant 0 : index
    %c0_29 = arith.constant 0 : index
    %39 = vector.load %arg9[%c0_27, %c0_28, %c0_29] : memref<1x32x1xf32, #tpu.memory_space<vmem>>, vector<1x32x1xf32>
    %40 = vector.shape_cast %39 : vector<1x32x1xf32> to vector<32x1xf32>
    %41 = arith.mulf %27, %27 : vector<32x128xf32>
    %cst_30 = arith.constant dense<0.000000e+00> : vector<32xf32>
    %42 = vector.multi_reduction <add>, %41, %cst_30 [1] : vector<32x128xf32> to vector<32xf32>
    %43 = vector.shape_cast %42 : vector<32xf32> to vector<32x1xf32>
    %44 = arith.addf %40, %43 : vector<32x1xf32>
    %c0_31 = arith.constant 0 : index
    %c0_32 = arith.constant 0 : index
    %c0_33 = arith.constant 0 : index
    %45 = vector.load %arg9[%c0_31, %c0_32, %c0_33] : memref<1x32x1xf32, #tpu.memory_space<vmem>>, vector<1x32x1xf32>
    %46 = vector.shape_cast %45 : vector<1x32x1xf32> to vector<32x1xf32>
    %47 = vector.shape_cast %44 : vector<32x1xf32> to vector<1x32x1xf32>
    tpu.vector_store %arg9[%c0_31, %c0_32, %c0_33], %47 {strides = array<i32>} : memref<1x32x1xf32, #tpu.memory_space<vmem>>, vector<1x32x1xf32>,
    return
  }
  func.func @transform_0(%arg0: i32, %arg1: i32) -> (i32, i32, i32) {
    %c0_i32 = arith.constant 0 : i32
    %c0_i32_0 = arith.constant 0 : i32
    return %arg0, %c0_i32, %arg1 : i32, i32, i32
  }
  func.func @transform_1(%arg0: i32, %arg1: i32) -> (i32, i32) {
    %c0_i32 = arith.constant 0 : i32
    %c0_i32_0 = arith.constant 0 : i32
    %c0_i32_1 = arith.constant 0 : i32
    return %c0_i32, %c0_i32_0 : i32, i32
  }
  func.func @transform_2(%arg0: i32, %arg1: i32) -> (i32, i32) {
    %c0_i32 = arith.constant 0 : i32
    %c0_i32_0 = arith.constant 0 : i32
    %c0_i32_1 = arith.constant 0 : i32
    return %c0_i32, %c0_i32_0 : i32, i32
  }
  func.func @transform_3(%arg0: i32, %arg1: i32) -> (i32, i32) {
    %c0_i32 = arith.constant 0 : i32
    %c0_i32_0 = arith.constant 0 : i32
    %c0_i32_1 = arith.constant 0 : i32
    return %c0_i32, %c0_i32_0 : i32, i32
  }
  func.func @transform_4(%arg0: i32, %arg1: i32) -> (i32, i32) {
    %c0_i32 = arith.constant 0 : i32
    %c0_i32_0 = arith.constant 0 : i32
    return %c0_i32, %arg1 : i32, i32
  }
  func.func @transform_5(%arg0: i32, %arg1: i32) -> (i32, i32, i32) {
    %c0_i32 = arith.constant 0 : i32
    %c0_i32_0 = arith.constant 0 : i32
    return %arg0, %c0_i32, %arg1 : i32, i32, i32
  }
  func.func @transform_6(%arg0: i32, %arg1: i32) -> (i32, i32, i32) {
    %c0_i32 = arith.constant 0 : i32
    %c0_i32_0 = arith.constant 0 : i32
    %c0_i32_1 = arith.constant 0 : i32
    return %arg0, %c0_i32, %c0_i32_0 : i32, i32, i32
  }
  func.func @transform_7(%arg0: i32, %arg1: i32) -> (i32, i32, i32) {
    %c0_i32 = arith.constant 0 : i32
    %c0_i32_0 = arith.constant 0 : i32
    %c0_i32_1 = arith.constant 0 : i32
    return %arg0, %c0_i32, %c0_i32_0 : i32, i32, i32
  }
}

module attributes {stable_mosaic.version = 11 : i64} {
  func.func @_bn_apply_kernel(%arg0: i32, %arg1: i32, %arg2: memref<1x32x128xf32, #tpu.memory_space<vmem>>, %arg3: memref<32x1xf32, #tpu.memory_space<vmem>>, %arg4: memref<32x1xf32, #tpu.memory_space<vmem>>, %arg5: memref<1x32x128xf32, #tpu.memory_space<vmem>>) attributes {dimension_semantics = [#tpu.dimension_semantics<parallel>, #tpu.dimension_semantics<parallel>], iteration_bounds = array<i64: 2, 2>, scalar_prefetch = 0 : i64, scratch_operands = 0 : i64, tpu.core_type = #tpu.core_type<tc>, window_params = [{transform_indices = @transform_0, window_bounds = array<i64: 1, 32, 128>}, {pipeline_mode = #tpu.pipeline_mode<synchronous>, transform_indices = @transform_1, window_bounds = array<i64: 32, 1>}, {pipeline_mode = #tpu.pipeline_mode<synchronous>, transform_indices = @transform_2, window_bounds = array<i64: 32, 1>}, {transform_indices = @transform_3, window_bounds = array<i64: 1, 32, 128>}]} {
    %c0 = arith.constant 0 : index
    %c0_0 = arith.constant 0 : index
    %c0_1 = arith.constant 0 : index
    %0 = vector.load %arg2[%c0, %c0_0, %c0_1] : memref<1x32x128xf32, #tpu.memory_space<vmem>>, vector<1x32x128xf32>
    %1 = vector.shape_cast %0 : vector<1x32x128xf32> to vector<32x128xf32>
    %c0_2 = arith.constant 0 : index
    %c0_3 = arith.constant 0 : index
    %2 = vector.load %arg3[%c0_2, %c0_3] : memref<32x1xf32, #tpu.memory_space<vmem>>, vector<32x1xf32>
    %3 = vector.broadcast %2 : vector<32x1xf32> to vector<32x128xf32>
    %4 = arith.mulf %1, %3 : vector<32x128xf32>
    %c0_4 = arith.constant 0 : index
    %c0_5 = arith.constant 0 : index
    %5 = vector.load %arg4[%c0_4, %c0_5] : memref<32x1xf32, #tpu.memory_space<vmem>>, vector<32x1xf32>
    %6 = vector.broadcast %5 : vector<32x1xf32> to vector<32x128xf32>
    %7 = arith.addf %4, %6 : vector<32x128xf32>
    %c0_6 = arith.constant 0 : index
    %c0_7 = arith.constant 0 : index
    %c0_8 = arith.constant 0 : index
    %8 = vector.load %arg5[%c0_6, %c0_7, %c0_8] : memref<1x32x128xf32, #tpu.memory_space<vmem>>, vector<1x32x128xf32>
    %9 = vector.shape_cast %8 : vector<1x32x128xf32> to vector<32x128xf32>
    %10 = vector.shape_cast %7 : vector<32x128xf32> to vector<1x32x128xf32>
    tpu.vector_store %arg5[%c0_6, %c0_7, %c0_8], %10 {strides = array<i32>} : memref<1x32x128xf32, #tpu.memory_space<vmem>>, vector<1x32x128xf32>,
    return
  }
  func.func @transform_0(%arg0: i32, %arg1: i32) -> (i32, i32, i32) {
    %c0_i32 = arith.constant 0 : i32
    %c0_i32_0 = arith.constant 0 : i32
    return %arg0, %c0_i32, %arg1 : i32, i32, i32
  }
  func.func @transform_1(%arg0: i32, %arg1: i32) -> (i32, i32) {
    %c0_i32 = arith.constant 0 : i32
    %c0_i32_0 = arith.constant 0 : i32
    %c0_i32_1 = arith.constant 0 : i32
    return %c0_i32, %c0_i32_0 : i32, i32
  }
  func.func @transform_2(%arg0: i32, %arg1: i32) -> (i32, i32) {
    %c0_i32 = arith.constant 0 : i32
    %c0_i32_0 = arith.constant 0 : i32
    %c0_i32_1 = arith.constant 0 : i32
    return %c0_i32, %c0_i32_0 : i32, i32
  }
  func.func @transform_3(%arg0: i32, %arg1: i32) -> (i32, i32, i32) {
    %c0_i32 = arith.constant 0 : i32
    %c0_i32_0 = arith.constant 0 : i32
    return %arg0, %c0_i32, %arg1 : i32, i32, i32
  }
}

</mosaic_0001>

<bundles_post_ra>
// kernel: tile.0
= control target key start
LH: loop header
LB: loop body
LE: loop exit
PB: predicated region body
PF: predicated region fallthrough
CT: control target
= control target key end

     0   :  { %s66_s8 = smov 125   ;;  %vm7_vm0 = vcmask 7168   ;;  %s67_s11 = smov 126   ;;  %s117_s0 = inlined_call_operand.vmem [shape: f32[4,8], index: 0, kind: input, shape index: {}]   ;;  %s118_s1 = inlined_call_operand.vmem [shape: f32[32,1], index: 1, kind: output, shape index: {}]  }
   0x1   :  { %v4_v0 = vld [vmem:[%s117_s0] sm:$0xf]  ;;  %s65_s0 = smov 127   ;;  %s68_s12 = smov 124  }
   0x2   :  { %5 = vst [vmem:[#allocation0] sm:$0xf] %v4_v0  ;;  %s69_s13 = smov 123   ;;  %s70_s14 = smov 122  }
   0x3   :  { %s71_s15 = smov 121  }
   0x9   :  { %v9_v1 = vld [vmem:[#allocation0] sm:$0xf]  }
   0xa   :  { %v21_v2 = vld [vmem:[#allocation0] sm:$0xf]   ;;  %10 = vrot.lane.b32.xlu0 %v9_v1, %s65_s0 }
   0xb   :  { %22 = vrot.lane.b32.xlu1 %v21_v2, %s66_s8  ;;  %v15_v3 = vld [vmem:[#allocation0] sm:$0xf]  }
   0xc   :  { %v27_v4 = vld [vmem:[#allocation0] sm:$0xf]  }
   0xd   :  { %v6_v5 = vld [vmem:[#allocation0] sm:$0xf]  }
   0xe   :  { %8 = vst.msk [vmem:[%s118_s1] ss:$8 sm:$0xf] %vm7_vm0, %v6_v5   ;;  %16 = vrot.lane.b32.xlu0 %v15_v3, %s67_s11  ;;  %v33_v6 = vld [vmem:[#allocation0] sm:$0xf]  }
   0xf   :  { %28 = vrot.lane.b32.xlu1 %v27_v4, %s68_s12  ;;  %v39_v7 = vld [vmem:[#allocation0] sm:$0xf]  }
  0x10   :  { %v45_v8 = vld [vmem:[#allocation0] sm:$0xf]  }
  0x12   :  { %34 = vrot.lane.b32.xlu0 %v33_v6, %s69_s13 }
  0x13   :  { %40 = vrot.lane.b32.xlu1 %v39_v7, %s70_s14 }
  0x16   :  { %46 = vrot.lane.b32.xlu0 %v45_v8, %s71_s15 }
  0x7c   :  { %v11_v9 = vpop.permute.xlu0 %10  }
  0x7d   :  { %v23_v10 = vpop.permute.xlu1 %22   ;;  %51 = vst.msk [vmem:[%s118_s1 + $0x1] ss:$8 sm:$0xf] %vm7_vm0, %v11_v9  }
  0x7e   :  { %53 = vst.msk [vmem:[%s118_s1 + $0x3] ss:$8 sm:$0xf] %vm7_vm0, %v23_v10  }
  0x80   :  { %v17_v11 = vpop.permute.xlu0 %16  }
  0x81   :  { %v29_v12 = vpop.permute.xlu1 %28   ;;  %52 = vst.msk [vmem:[%s118_s1 + $0x2] ss:$8 sm:$0xf] %vm7_vm0, %v17_v11  }
  0x82   :  { %54 = vst.msk [vmem:[%s118_s1 + $0x4] ss:$8 sm:$0xf] %vm7_vm0, %v29_v12  }
  0x84   :  { %v35_v13 = vpop.permute.xlu0 %34  }
  0x85   :  { %v41_v14 = vpop.permute.xlu1 %40   ;;  %55 = vst.msk [vmem:[%s118_s1 + $0x5] ss:$8 sm:$0xf] %vm7_vm0, %v35_v13  }
  0x86   :  { %56 = vst.msk [vmem:[%s118_s1 + $0x6] ss:$8 sm:$0xf] %vm7_vm0, %v41_v14  }
  0x88   :  { %v47_v15 = vpop.permute.xlu0 %46  }
  0x89   :  { %57 = vst.msk [vmem:[%s118_s1 + $0x7] ss:$8 sm:$0xf] %vm7_vm0, %v47_v15  }

// kernel: tile.18
= control target key start
LH: loop header
LB: loop body
LE: loop exit
PB: predicated region body
PF: predicated region fallthrough
CT: control target
= control target key end

     0   :  { %2 = vsyncpa [#allocation1], 0  ;;  %s44_s6 = smov [#allocation0]   ;;  %s70_s0 = inlined_call_operand.hbm [shape: f32[8], index: 0, kind: input, shape index: {}]   ;;  %s71_s1 = inlined_call_operand.vmem [shape: f32[4,8], index: 1, kind: output, shape index: {}]  }
   0x1   :  { %s9_s7 = sshll.u32 %s44_s6, 4  ;;  %s20_s10 = scalar_lea.hbm %s70_s0, 16  ;;  %s10_s7 = int_to_ptr.vmem [resolvable:$true] %s9_s7 }
   0x2   :  { %p21_p0 = scmp.ne.s32.totalorder %s70_s0, %s20_s10  ;;  %p24_p1 = scmp.lt.u32.totalorder %s20_s10, %s70_s0 }
   0x4   :  { %p26_p2 = pnand %p24_p1, %p21_p0 }
   0x6   :  { %29 = shalt.err (!%p26_p2)
}
   0x7   :  { %s30_s15 = scalar_lea.vmem %s10_s7, 16  ;;  %s34_s16 = scalar_lea.vmem %s10_s7, 32 }
   0x8   :  { %p31_p3 = scmp.ne.s32.totalorder %s10_s7, %s30_s15  ;;  %p35_p4 = scmp.lt.s32.totalorder %s10_s7, %s10_s7 }
   0x9   :  { %p36_p5 = scmp.lt.s32.totalorder %s34_s16, %s30_s15 }
   0xb   :  { %p37_p6 = por %p36_p5, %p35_p4 }
   0xd   :  { %p38_p7 = pnand %p37_p6, %p31_p3 }
   0xf   :  { %41 = shalt.err (!%p38_p7)
}
  0x10   :  { %12 = dma.hbm_to_vmem [thread:$0]  %s70_s0, 16, %s10_s7, [#allocation1]  }
  0x11   :  { %42 = dma.done.wait [#allocation1], 16  }
  0x12   :  { %43 = vsyncadd [#allocation1], 4294967280  ;;  %v16_v0 = vld [vmem:[#allocation0] ss:$0 sm:$0xff] }
  0x13   :  { %17 = vst [vmem:[%s71_s1] sm:$0xf] %v16_v0 }
  0x14   :  { %18 = vsyncpa [#allocation1], 1 }

// kernel: tile.28
= control target key start
LH: loop header
LB: loop body
LE: loop exit
PB: predicated region body
PF: predicated region fallthrough
CT: control target
= control target key end

     0   :  { %s22_s0 = inlined_call_operand.vmem [shape: f32[8], index: 0, kind: input, shape index: {}]   ;;  %s23_s1 = inlined_call_operand.vmem [shape: f32[4,8], index: 1, kind: output, shape index: {}]  }
   0x1   :  { %v4_v0 = vld [vmem:[%s22_s0] ss:$0 sm:$0xff] }
   0x2   :  { %5 = vst [vmem:[%s23_s1] sm:$0xf] %v4_v0 }

// kernel: conv_transpose_block.3
= control target key start
LH: loop header
LB: loop body
LE: loop exit
PB: predicated region body
PF: predicated region fallthrough
CT: control target
= control target key end

     0   :  { %s571_s12 = smov 0   ;;  %s573_s13 = smov 0   ;;  %s691_s0 = inlined_call_operand.vmem [shape: f32[2,32,256], index: 0, kind: input, shape index: {}, may-alias: {0,3}]   ;;  %s692_s1 = inlined_call_operand.vmem [shape: f32[32,1], index: 1, kind: input, shape index: {}]   ;;  %s693_s2 = inlined_call_operand.vmem [shape: f32[32,1], index: 2, kind: input, shape index: {}]   ;;  %s694_s3 = inlined_call_operand.vmem [shape: f32[2,32,256], index: 3, kind: output, shape index: {}, may-alias: {0,3}]  }
   0x1   :  { %s575_s14 = smov 0   ;;  %s577_s15 = smov 0  }
   0x2   :  { %s579_s16 = smov 0   ;;  %s581_s17 = smov 0  }
   0x3   :  { %s583_s18 = smov 0  }
   0x4 LB: > { %s22_s19 = sadd.s32 1, %s540_s16  ;;  %s25_s20 = sadd.s32 1, %s544_s17  ;;  %s548_s18 = sphi %s583_s18, %s13_s18   ;;  %s544_s17 = sphi %s581_s17, %s701_s17   ;;  %s540_s16 = sphi %s579_s16, %s700_s16   ;;  %s536_s15 = sphi %s577_s15, %s699_s15   ;;  %s532_s14 = sphi %s575_s14, %s698_s14   ;;  %s528_s13 = sphi %s573_s13, %s697_s13   ;;  %s524_s12 = sphi %s571_s12, %s696_s12  }
   0x5   : > { %p23_p0 = scmp.ge.s32.totalorder %s22_s19, 2  ;;  %s420_s21 = sadd.s32 4294967295, %s548_s18  }
   0x6   : > { %p41_p1 = scmp.ne.s32.totalorder %s528_s13, %s524_s12  ;;  %p42_p2 = scmp.eq.s32.totalorder %s548_s18, 0 }
   0x7   : > { %s703_s19 = smov (%p23_p0, %s22_s19), 0  ;;  %s705_s20 = smov (!%p23_p0, %s25_s20), %s544_s17 }
   0x8   : > { %p27_p3 = scmp.ge.s32.totalorder %s705_s20, 2  ;;  %p115_p4 = scmp.eq.s32.totalorder %s420_s21, 3 }
   0x9   : > { %s30_s22 = ssub.s32 %s540_s16, %s703_s19  ;;  %p43_p5 = por %p42_p2, %p41_p1 }
   0xa   : > { %s707_s20 = smov (%p27_p3, %s705_s20), 0  ;;  %p619_p6 = por %p115_p4, %p41_p1 }
   0xb   : > { %s29_s24 = ssub.s32 %s544_s17, %s707_s20  ;;  %s34_s26 = sadd.s32 1, %s528_s13 }
   0xc   : > { %s31_s25 = sor.u32 %s30_s22, %s29_s24  ;;  %p423_p8 = scmp.ge.s32.totalorder %s548_s18, 4 }
   0xd   : > { %p32_p7 = scmp.eq.s32.totalorder %s31_s25, 0 }
   0xe   : > { %143 = sbr.rel (%p423_p8) target bundleno = 29 (0x1d), region = 24 }
   0xf   : > { %s627_s27 = scalar_select %p32_p7, %s528_s13, %s34_s26  }
  0x15   : > { %146 = sbr.rel (!%p43_p5) target bundleno = 29 (0x1d), region = 28  ;;  %s148_s28 = sand.u32 (%p43_p5), 1, %s528_s13  }
  0x16   : > { %s425_s29 = sshll.u32 (%p43_p5), %s544_s17, 3  ;;  %s424_s30 = sshll.u32 (%p43_p5), %s148_s28, 5 }
  0x17   : > { %s152_s4 = sadd.s32 (%p43_p5), %s540_s16, %s425_s29  ;;  %s150_s9 = scalar_lea.vmem (%p43_p5), [#allocation2], %s424_s30 }
  0x18   : > { %s426_s5 = sshll.u32 (%p43_p5), %s152_s4, 3 }
  0x19   : > { %s154_s8 = scalar_lea.vmem (%p43_p5), %s691_s0, %s426_s5 }
  0x1a   : > { %v188_v0 = vld [vmem:[%s154_s8] sm:$0xff] (%p43_p5)  ;;  %v190_v1 = vld [vmem:[%s154_s8 + $0x10] sm:$0xff] (%p43_p5) }
  0x1b   : > { %v192_v2 = vld [vmem:[%s154_s8 + $0x20] sm:$0xff] (%p43_p5)  ;;  %189 = vst [vmem:[%s150_s9] sm:$0xff] (%p43_p5), %v188_v0  ;;  %191 = vst [vmem:[%s150_s9 + $0x8] sm:$0xff] (%p43_p5), %v190_v1  ;;  %v194_v3 = vld [vmem:[%s154_s8 + $0x30] sm:$0xff] (%p43_p5) }
  0x1c   : > { %193 = vst [vmem:[%s150_s9 + $0x10] sm:$0xff] %v192_v2  ;;  %195 = vst [vmem:[%s150_s9 + $0x18] sm:$0xff] %v194_v3 }
  0x1d PF: > { %p427_p9 = scmp.ge.s32.totalorder %s548_s18, 1  ;;  %p200_p10 = scmp.lt.s32.totalorder %s548_s18, 5 }
  0x1f   : > { %p201_p11 = pnand %p427_p9, %p200_p10 }
  0x20   : > { %v235_v4 = vld [vmem:[%s692_s1 + $0x10] sm:$0xff] (!%p201_p11)  ;;  %v233_v5 = vld [vmem:[%s692_s1] sm:$0xff] (!%p201_p11)  ;;  %v550_v6 = vmov (!%p201_p11), 0   ;;  %v236_v7 = vld [vmem:[%s692_s1 + $0x18] sm:$0xff] (!%p201_p11)  ;;  %s207_s10 = sand.u32 (!%p201_p11), 1, %s524_s12  }
  0x21   : > { %204 = sbr.rel (%p201_p11) target bundleno = 185 (0xb9), region = 66  ;;  %493 = vset.pattern.permute.xlu1 (!%p201_p11), %v550_v6  ;;  %492 = vset.pattern.permute.xlu0 (!%p201_p11), %v550_v6  ;;  %v234_v8 = vld [vmem:[%s692_s1 + $0x8] sm:$0xff] (!%p201_p11)  ;;  %v261_v10 = vld [vmem:[%s693_s2] sm:$0xff] (!%p201_p11)  ;;  %v264_v11 = vld [vmem:[%s693_s2 + $0x18] sm:$0xff] (!%p201_p11)  ;;  %s428_s11 = sshll.u32 (!%p201_p11), %s207_s10, 5 }
  0x22   : > { %249 = vperm.xlu1 (!%p201_p11), %493, %v235_v4   ;;  %239 = vperm.xlu0 (!%p201_p11), %492, %v233_v5   ;;  %v262_v9 = vld [vmem:[%s693_s2 + $0x8] sm:$0xff] (!%p201_p11)  ;;  %v263_v12 = vld [vmem:[%s693_s2 + $0x10] sm:$0xff] (!%p201_p11)  ;;  %s209_s21 = scalar_lea.vmem (!%p201_p11), [#allocation2], %s428_s11  ;;  %s228_s22 = scalar_lea.vmem (!%p201_p11), [#allocation3], %s428_s11 }
  0x23   : > { %v229_v15 = vld [vmem:[%s209_s21] sm:$0xff] (!%p201_p11)  ;;  %v230_v18 = vld [vmem:[%s209_s21 + $0x8] sm:$0xff] (!%p201_p11)  ;;  %v231_v21 = vld [vmem:[%s209_s21 + $0x10] sm:$0xff] (!%p201_p11) }
  0x24   : > { %v232_v22 = vld [vmem:[%s209_s21 + $0x18] sm:$0xff] (!%p201_p11) }
  0x26   : > { %254 = vperm.xlu1 (!%p201_p11), %493, %v236_v7   ;;  %244 = vperm.xlu0 (!%p201_p11), %492, %v234_v8  }
  0x28   : > { %s431_s12 = sshll.u32 (%p619_p6), %s536_s15, 3 }
  0x29   : > { %s301_s24 = sadd.s32 (%p619_p6), %s532_s14, %s431_s12 }
  0x2a   : > { %272 = vperm.xlu1 %493, %v262_v9   ;;  %267 = vperm.xlu0 %492, %v261_v10   ;;  %s432_s25 = sshll.u32 (%p619_p6), %s301_s24, 3 }
  0x2b   : > { %s303_s29 = scalar_lea.vmem (%p619_p6), %s694_s3, %s432_s25 }
  0x2e   : > { %282 = vperm.xlu1 %493, %v264_v11   ;;  %277 = vperm.xlu0 %492, %v263_v12  }
  0xa1   : > { %v250_v13 = vpop.permute.xlu1 %249  ;;  %v240_v14 = vpop.permute.xlu0 %239 }
  0xa2   : > { %v257_v19 = vmul.f32 %v240_v14, %v229_v15  ;;  %v259_v27 = vmul.f32 %v250_v13, %v231_v21 }
  0xa5   : > { %v255_v16 = vpop.permute.xlu1 %254  ;;  %v245_v17 = vpop.permute.xlu0 %244 }
  0xa6   : > { %v258_v20 = vmul.f32 %v245_v17, %v230_v18  ;;  %v260_v28 = vmul.f32 %v255_v16, %v232_v22 }
  0xa9   : > { %v273_v23 = vpop.permute.xlu1 %272  ;;  %v268_v24 = vpop.permute.xlu0 %267 }
  0xaa   : > { %v286_v25 = vadd.f32 %v273_v23, %v258_v20  ;;  %v285_v26 = vadd.f32 %v268_v24, %v257_v19  ;;  %299 = sbr.rel (!%p619_p6) target bundleno = 185 (0xb9), region = 74 }
  0xac   : > { %290 = vst [vmem:[%s228_s22 + $0x8] sm:$0xff] %v286_v25  ;;  %289 = vst [vmem:[%s228_s22] sm:$0xff] %v285_v26 }
  0xad   : > { %v283_v29 = vpop.permute.xlu1 %282  ;;  %v278_v30 = vpop.permute.xlu0 %277 }
  0xae   : > { %v288_v31 = vadd.f32 %v283_v29, %v260_v28  ;;  %v287_v32 = vadd.f32 %v278_v30, %v259_v27 }
  0xb0   : > { %292 = vst [vmem:[%s228_s22 + $0x18] sm:$0xff] %v288_v31  ;;  %291 = vst [vmem:[%s228_s22 + $0x10] sm:$0xff] %v287_v32 }
  0xb3   : > { %v337_v33 = vld [vmem:[%s228_s22] sm:$0xff]  ;;  %v339_v34 = vld [vmem:[%s228_s22 + $0x8] sm:$0xff] }
  0xb4   : > { %338 = vst [vmem:[%s303_s29] sm:$0xff] %v337_v33  ;;  %340 = vst [vmem:[%s303_s29 + $0x10] sm:$0xff] %v339_v34 }
  0xb7   : > { %v341_v35 = vld [vmem:[%s228_s22 + $0x10] sm:$0xff]  ;;  %v343_v36 = vld [vmem:[%s228_s22 + $0x18] sm:$0xff] }
  0xb8   : > { %342 = vst [vmem:[%s303_s29 + $0x20] sm:$0xff] %v341_v35  ;;  %344 = vst [vmem:[%s303_s29 + $0x30] sm:$0xff] %v343_v36 }
  0xb9 PF: > { %s13_s18 = sadd.s32 1, %s548_s18   ;;  %s696_s12 = smov %s528_s13 }
  0xba   : > { %p10_p12 = scmp.ge.s32.totalorder %s13_s18, 6   ;;  %s697_s13 = smov %s627_s27 }
  0xbb   : > { %s698_s14 = smov %s540_s16  ;;  %s699_s15 = smov %s544_s17 }
  0xbc   : > { %s700_s16 = smov %s703_s19  ;;  %s701_s17 = smov %s707_s20 }
  0xbd   :  { %12 = sbr.rel (!%p10_p12) target bundleno = 4 (0x4), region = 143 }

// kernel: conv_transpose_block.2
= control target key start
LH: loop header
LB: loop body
LE: loop exit
PB: predicated region body
PF: predicated region fallthrough
CT: control target
= control target key end

     0   :  { %s1259_s0 = inlined_call_operand.vmem [shape: f32[2,16,256], index: 0, kind: input, shape index: {}]   ;;  %s1260_s1 = inlined_call_operand.vmem [shape: f32[32,16], index: 1, kind: input, shape index: {}]   ;;  %s1261_s2 = inlined_call_operand.vmem [shape: f32[32,1], index: 2, kind: input, shape index: {}]   ;;  %s1262_s3 = inlined_call_operand.vmem [shape: f32[32,2], index: 3, kind: input, shape index: {}]   ;;  %s1263_s4 = inlined_call_operand.vmem [shape: f32[2,256], index: 4, kind: input, shape index: {}]   ;;  %s1264_s5 = inlined_call_operand.vmem [shape: f32[2,32,256], index: 5, kind: output, shape index: {0}]   ;;  %s1265_s6 = inlined_call_operand.vmem [shape: f32[2,32,1], index: 6, kind: output, shape index: {1}]   ;;  %s1266_s7 = inlined_call_operand.vmem [shape: f32[2,32,1], index: 7, kind: output, shape index: {2}]  }
   0x1   :  { %1270 = sst [smem:[#allocation7_spill]] %s1259_s0 }
   0x2   :  { %s1059_s24 = smov 0   ;;  %s1061_s25 = smov 0  }
   0x3   :  { %s1063_s26 = smov 0   ;;  %s1065_s27 = smov 0  }
   0x4   :  { %s1067_s28 = smov 0   ;;  %s1069_s29 = smov 0  }
   0x5   :  { %s1071_s30 = smov 0  }
   0x6 LB: > { %1271 = sst [smem:[#allocation4_spill]] %s1010_s29  ;;  %s27_s8 = sadd.s32 1, %s1006_s28  ;;  %s1014_s30 = sphi %s1071_s30, %s18_s30   ;;  %s1010_s29 = sphi %s1069_s29, %s1278_s29   ;;  %s1006_s28 = sphi %s1067_s28, %s1282_s28   ;;  %s1002_s27 = sphi %s1065_s27, %s1276_s27   ;;  %s998_s26 = sphi %s1063_s26, %s1281_s26   ;;  %s994_s25 = sphi %s1061_s25, %s1280_s25   ;;  %s990_s24 = sphi %s1059_s24, %s1279_s24  }
   0x7   : > { %p28_p0 = scmp.ge.s32.totalorder %s27_s8, 2  ;;  %s30_s9 = sadd.s32 1, %s1010_s29 }
   0x8   : > { %s844_s10 = sadd.s32 4294967295, %s1014_s30   ;;  %p46_p1 = scmp.ne.s32.totalorder %s994_s25, %s990_s24 }
   0x9   : > { %s1284_s8 = smov (%p28_p0, %s27_s8), 0  ;;  %s1286_s9 = smov (!%p28_p0, %s30_s9), %s1010_s29 }
   0xa   : > { %1272 = sst [smem:[#allocation5_spill]] %s1284_s8  ;;  %p47_p2 = scmp.eq.s32.totalorder %s1014_s30, 0 }
   0xb   : > { %p32_p3 = scmp.ge.s32.totalorder %s1286_s9, 2  ;;  %p167_p4 = scmp.eq.s32.totalorder %s844_s10, 3 }
   0xc   : > { %s35_s11 = ssub.s32 %s1006_s28, %s1284_s8  ;;  %p48_p5 = por %p47_p2, %p46_p1 }
   0xd   : > { %s1288_s9 = smov (%p32_p3, %s1286_s9), 0  ;;  %p1107_p6 = por %p167_p4, %p46_p1 }
   0xe   : > { %1273 = sst [smem:[#allocation6_spill]] %s1288_s9  ;;  %s34_s13 = ssub.s32 %s1010_s29, %s1288_s9 }
   0xf   : > { %s36_s14 = sor.u32 %s35_s11, %s34_s13  ;;  %s39_s15 = sadd.s32 1, %s994_s25 }
  0x10   : > { %p37_p7 = scmp.eq.s32.totalorder %s36_s14, 0  ;;  %p847_p8 = scmp.ge.s32.totalorder %s1014_s30, 4 }
  0x12   : > { %s1115_s16 = scalar_select %p37_p7, %s994_s25, %s39_s15  }
  0x13   : > { %250 = sbr.rel (%p847_p8) target bundleno = 37 (0x25), region = 28 }
  0x1a   : > { %253 = sbr.rel (!%p48_p5) target bundleno = 37 (0x25), region = 32  ;;  %s255_s17 = sand.u32 (%p48_p5), 1, %s994_s25  }
  0x1b   : > { %s849_s18 = sshll.u32 (%p48_p5), %s1010_s29, 2  ;;  %s848_s19 = sshll.u32 (%p48_p5), %s255_s17, 4 }
  0x1c   : > { %s259_s20 = sadd.s32 (%p48_p5), %s1006_s28, %s849_s18  ;;  %s1275_s0 = sld [smem:[#allocation7_spill]] (%p48_p5) }
  0x1d   : > { %s850_s21 = sshll.u32 (%p48_p5), %s259_s20, 3  ;;  %s257_s11 = scalar_lea.vmem (%p48_p5), [#allocation2], %s848_s19 }
  0x22   : > { %s261_s10 = scalar_lea.vmem %s1275_s0, %s850_s21 }
  0x23   : > { %v291_v0 = vld [vmem:[%s261_s10] sm:$0xff]  ;;  %v293_v1 = vld [vmem:[%s261_s10 + $0x10] sm:$0xff] }
  0x24   : > { %292 = vst [vmem:[%s257_s11] sm:$0xff] %v291_v0  ;;  %294 = vst [vmem:[%s257_s11 + $0x8] sm:$0xff] %v293_v1 }
  0x25 PF: > { %p851_p9 = scmp.ge.s32.totalorder %s1014_s30, 1  ;;  %p306_p10 = scmp.lt.s32.totalorder %s1014_s30, 5 }
  0x27   : > { %p307_p11 = pnand %p851_p9, %p306_p10 }
  0x28   : > { %s313_s13 = sand.u32 (!%p307_p11), 1, %s990_s24   ;;  %p357_p12 = scmp.lt.s32.totalorder (!%p307_p11), %s998_s26, 1 }
  0x29   : > { %310 = sbr.rel (%p307_p11) target bundleno = 445 (0x1bd), region = 74  ;;  %s852_s14 = sshll.u32 (!%p307_p11), %s313_s13, 4 }
  0x2a   : > { %s853_s15 = sshll.u32 (!%p307_p11), %s313_s13, 5  ;;  %p361_p13 = scmp.lt.s32.totalorder (!%p307_p11), %s1002_s27, 1 }
  0x2b   : > { %s315_s13 = scalar_lea.vmem (!%p307_p11), [#allocation2], %s852_s14  ;;  %s1146_s29 = scalar_lea.vmem (!%p307_p11), [#allocation3], %s853_s15 }
  0x2c   : > { %p859_p0 = scmp.ne.s32.totalorder (!%p307_p11), %s998_s26, 0 }
  0x30   : > { %s358_s17 = scalar_select %p357_p12, %s998_s26, 1 }
  0x31   : > { %s362_s22 = scalar_select %p361_p13, %s1002_s27, 1 }
  0x32   : > { %s854_s18 = sshll.u32 %s358_s17, 1  ;;  %374 = sbr.rel (%p859_p0) target bundleno = 57 (0x39), region = 82  ;;  %vm375_vm0 = vcmask (!%p859_p0), 7168   ;;  %v1016_v2 = vmov (!%p859_p0), 0.0  }
  0x33   : > { %s1133_s21 = scalar_lea.vmem %s1263_s4, %s854_s18  ;;  %s871_s23 = sshll.u32 %s362_s22, 5 }
  0x34   : > { %s1139_s0 = scalar_lea.vmem %s1265_s6, %s871_s23  ;;  %s1144_s8 = scalar_lea.vmem %s1266_s7, %s871_s23 }
  0x35   : > { %376 = vst.msk [vmem:[%s1139_s0] sm:$0xff] (!%p859_p0), %vm375_vm0, %v1016_v2  ;;  %377 = vst.msk [vmem:[%s1139_s0 + $0x8] sm:$0xff] (!%p859_p0), %vm375_vm0, %v1016_v2 }
  0x36   : > { %378 = vst.msk [vmem:[%s1139_s0 + $0x10] sm:$0xff] (!%p859_p0), %vm375_vm0, %v1016_v2  ;;  %379 = vst.msk [vmem:[%s1139_s0 + $0x18] sm:$0xff] (!%p859_p0), %vm375_vm0, %v1016_v2 }
  0x37   : > { %380 = vst.msk [vmem:[%s1144_s8] sm:$0xff] (!%p859_p0), %vm375_vm0, %v1016_v2  ;;  %381 = vst.msk [vmem:[%s1144_s8 + $0x8] sm:$0xff] (!%p859_p0), %vm375_vm0, %v1016_v2 }
  0x38   : > { %382 = vst.msk [vmem:[%s1144_s8 + $0x10] sm:$0xff] (!%p859_p0), %vm375_vm0, %v1016_v2  ;;  %383 = vst.msk [vmem:[%s1144_s8 + $0x18] sm:$0xff] (!%p859_p0), %vm375_vm0, %v1016_v2 }
  0x39 PF: > { %v388_v3 = vld [vmem:[%s315_s13] sm:$0xff]  ;;  %v389_v4 = vld [vmem:[%s315_s13 + $0x8] sm:$0xff]  ;;  %vm414_vm1 = vcmask 130048   ;;  %v1017_v8 = vmov 0   ;;  %v1018_v10 = vmov 1   ;;  %vm610_vm2 = vcmask 7168  }
  0x3a   : > { %v384_v5 = vld [vmem:[%s1260_s1] sm:$0xff]  ;;  %v889_v6 = vpack.c.bf16 %v389_v4, %v388_v3  ;;  %v386_v7 = vld [vmem:[%s1260_s1 + $0x10] sm:$0xff]  ;;  %954 = vset.pattern.permute.xlu1 %v1017_v8  ;;  %955 = vset.pattern.permute.xlu0 %v1018_v10  ;;  %v385_v12 = vld [vmem:[%s1260_s1 + $0x8] sm:$0xff] }
  0x3b   : > { %883 = vmatprep.mubr.msk.f32.mxu0 %vm414_vm1, %v384_v5  ;;  %886 = vmatprep.mubr.msk.f32.mxu1 %vm414_vm1, %v386_v7  ;;  %v518_v9 = vld [vmem:[%s1262_s3 + $0x10] sm:$0xff]  ;;  %v516_v11 = vld [vmem:[%s1262_s3] sm:$0xff]  ;;  %v387_v13 = vld [vmem:[%s1260_s1 + $0x18] sm:$0xff] }
  0x3c   : > { %890 = vmatprep.subr.bf16.mxu0 %v889_v6  ;;  %893 = vmatprep.subr.bf16.mxu1 %v889_v6  ;;  %v519_v14 = vld [vmem:[%s1262_s3 + $0x18] sm:$0xff]  ;;  %v517_v15 = vld [vmem:[%s1262_s3 + $0x8] sm:$0xff]  ;;  %v390_v17 = vld [vmem:[%s1261_s2] sm:$0xff] }
  0x3d   : > { %892 = vmatpush3.bf16.msra.mxu0 %v889_v6  ;;  %894 = vmatpush3.bf16.msra.mxu1 %v889_v6  ;;  %v391_v16 = vld [vmem:[%s1261_s2 + $0x8] sm:$0xff]  ;;  %v392_v18 = vld [vmem:[%s1261_s2 + $0x10] sm:$0xff]  ;;  %v393_v19 = vld [vmem:[%s1261_s2 + $0x18] sm:$0xff] }
  0x3e   : > { %533 = vperm.xlu1 %954, %v518_v9   ;;  %555 = vperm.xlu0 %955, %v516_v11   ;;  %v864_v28 = vld [vmem:[%s1133_s21] ss:$0 sm:$0xff]  ;;  %v865_v29 = vld [vmem:[%s1133_s21 + $0x1] ss:$0 sm:$0xff] }
  0x40   : > { %884 = vmatmul.mubr.msk.f32.vlgmr.msra.gmra.mrb[0].mxu0 %vm414_vm1, %v385_v12  ;;  %887 = vmatmul.mubr.msk.f32.vlgmr.msra.gmra.mrb[0].mxu1 %vm414_vm1, %v387_v13 }
  0x42   : > { %538 = vperm.xlu1 %954, %v519_v14   ;;  %567 = vperm.xlu0 %955, %v519_v14  }
  0x46   : > { %956 = vset.pattern.permute.xlu1 %v1018_v10  ;;  %957 = vset.pattern.permute.xlu0 %v1017_v8 }
  0x47   : > { %559 = vperm.xlu1 %956, %v517_v15   ;;  %523 = vperm.xlu0 %957, %v516_v11   ;;  %v595_v11 = vld [vmem:[%s1139_s0 + $0x8] sm:$0xff] }
  0x4b   : > { %563 = vperm.xlu1 %956, %v518_v9   ;;  %528 = vperm.xlu0 %957, %v517_v15  }
  0x4f   : > { %958 = vset.pattern.permute.xlu1 %v1017_v8  ;;  %401 = vperm.xlu0 %957, %v391_v16   ;;  %v594_v16 = vld [vmem:[%s1139_s0] sm:$0xff] }
  0x50   : > { %396 = vperm.xlu1 %958, %v390_v17   ;;  %v615_v17 = vld [vmem:[%s1144_s8] sm:$0xff] }
  0x53   : > { %959 = vset.pattern.permute.xlu0 %v1018_v10  ;;  %v597_v10 = vld [vmem:[%s1139_s0 + $0x18] sm:$0xff] }
  0x54   : > { %406 = vperm.xlu1 %958, %v392_v18  }
  0x58   : > { %411 = vperm.xlu1 %958, %v393_v19  }
  0xbd   : > { %v534_v20 = vpop.permute.xlu1 %533  ;;  %v556_v22 = vpop.permute.xlu0 %555 }
  0xbe   : > { %v547_v36 = vmul.f32 %v864_v28, %v534_v20  ;;  %v574_v37 = vmul.f32 %v865_v29, %v556_v22  ;;  %v596_v22 = vld [vmem:[%s1139_s0 + $0x10] sm:$0xff] }
  0xc0   : > { %v551_v46 = vsub.f32 1.0, %v547_v36  ;;  %v578_v47 = vsub.f32 1.0, %v574_v37 }
  0xc1   : > { %v539_v21 = vpop.permute.xlu1 %538  ;;  %v568_v24 = vpop.permute.xlu0 %567 }
  0xc2   : > { %v548_v32 = vmul.f32 %v864_v28, %v539_v21  ;;  %v577_v34 = vmul.f32 %v865_v29, %v568_v24 }
  0xc4   : > { %v552_v41 = vsub.f32 1.0, %v548_v32  ;;  %v581_v43 = vsub.f32 1.0, %v577_v34 }
  0xc6   : > { %v560_v23 = vpop.permute.xlu1 %559  ;;  %v524_v26 = vpop.permute.xlu0 %523  ;;  %v585_v58 = vmul.f32 %v581_v43, %v552_v41 }
  0xc7   : > { %v575_v33 = vmul.f32 %v865_v29, %v560_v23  ;;  %v545_v39 = vmul.f32 %v864_v28, %v524_v26  ;;  %v617_v23 = vld [vmem:[%s1144_s8 + $0x10] sm:$0xff] }
  0xc9   : > { %v579_v42 = vsub.f32 1.0, %v575_v33  ;;  %v549_v49 = vsub.f32 1.0, %v545_v39 }
  0xca   : > { %v564_v25 = vpop.permute.xlu1 %563  ;;  %v529_v30 = vpop.permute.xlu0 %528 }
  0xcb   : > { %v546_v35 = vmul.f32 %v864_v28, %v529_v30  ;;  %v576_v38 = vmul.f32 %v865_v29, %v564_v25  ;;  %v582_v63 = vmul.f32 %v578_v47, %v549_v49  ;;  %v616_v28 = vld [vmem:[%s1144_s8 + $0x8] sm:$0xff] }
  0xcd   : > { %v550_v44 = vsub.f32 1.0, %v546_v35  ;;  %v580_v48 = vsub.f32 1.0, %v576_v38 }
  0xce   : > { %v402_v40 = vpop.permute.xlu0 %401 }
  0xcf   : > { %v397_v27 = vpop.permute.xlu1 %396  ;;  %v583_v59 = vmul.f32 %v579_v42, %v550_v44  ;;  %v584_v62 = vmul.f32 %v580_v48, %v551_v46 }
  0xd3   : > { %v407_v31 = vpop.permute.xlu1 %406 }
  0xd7   : > { %v412_v45 = vpop.permute.xlu1 %411 }
 0x113   : > { %v885_v50 = vpop.f32.mrb[0].mxu0  ;;  %v888_v51 = vpop.f32.mrb[0].mxu1 }
 0x114   : > { %v499_v52 = vadd.f32 %v885_v50, %v402_v40  ;;  %v509_v53 = vadd.f32 %v888_v51, %v412_v45  ;;  %v493_v54 = vpop.f32.mrb[1].mxu0  ;;  %v503_v55 = vpop.f32.mrb[1].mxu1 }
 0x115   : > { %v494_v56 = vadd.f32 %v493_v54, %v397_v27  ;;  %v504_v57 = vadd.f32 %v503_v55, %v407_v31  ;;  %v618_v31 = vld [vmem:[%s1144_s8 + $0x18] sm:$0xff] }
 0x116   : > { %v513_v60 = vmax.f32 %v499_v52, 0.0  ;;  %v515_v61 = vmax.f32 %v509_v53, 0.0 }
 0x117   : > { %v512_v0 = vmax.f32 %v494_v56, 0.0  ;;  %v514_v1 = vmax.f32 %v504_v57, 0.0 }
 0x118   : > { %v587_v2 = vmul.f32 %v583_v59, %v513_v60  ;;  %v589_v3 = vmul.f32 %v585_v58, %v515_v61 }
 0x119   : > { %v586_v4 = vmul.f32 %v582_v63, %v512_v0  ;;  %v588_v5 = vmul.f32 %v584_v62, %v514_v1 }
 0x11a   : > { %591 = vst [vmem:[%s1146_s29 + $0x8] sm:$0xff] %v587_v2  ;;  %593 = vst [vmem:[%s1146_s29 + $0x18] sm:$0xff] %v589_v3  ;;  %604 = vadd.xlane.f32.xlu0 %v589_v3  ;;  %600 = vadd.xlane.f32.xlu1 %v587_v2  ;;  %v620_v8 = vmul.f32 %v587_v2, %v587_v2  ;;  %v622_v9 = vmul.f32 %v589_v3, %v589_v3 }
 0x11b   : > { %590 = vst [vmem:[%s1146_s29] sm:$0xff] %v586_v4  ;;  %592 = vst [vmem:[%s1146_s29 + $0x10] sm:$0xff] %v588_v5  ;;  %v619_v6 = vmul.f32 %v586_v4, %v586_v4  ;;  %v621_v7 = vmul.f32 %v588_v5, %v588_v5 }
 0x11e   : > { %598 = vadd.xlane.f32.xlu0 %v586_v4  ;;  %623 = vadd.xlane.f32.xlu1 %v619_v6 }
 0x121   : > { %v695_v35 = vld [vmem:[%s1146_s29 + $0x8] sm:$0xff] (%p1107_p6)  ;;  %v699_v37 = vld [vmem:[%s1146_s29 + $0x18] sm:$0xff] (%p1107_p6) }
 0x122   : > { %602 = vadd.xlane.f32.xlu0 %v588_v5  ;;  %627 = vadd.xlane.f32.xlu1 %v621_v7  ;;  %v693_v34 = vld [vmem:[%s1146_s29] sm:$0xff] (%p1107_p6)  ;;  %v697_v36 = vld [vmem:[%s1146_s29 + $0x10] sm:$0xff] (%p1107_p6) }
 0x126   : > { %625 = vadd.xlane.f32.xlu0 %v620_v8 }
 0x12a   : > { %629 = vadd.xlane.f32.xlu0 %v622_v9 }
 0x1a7   : > { %v605_v12 = vpop.xlane.xlu0 %604  ;;  %v601_v13 = vpop.xlane.xlu1 %600 }
 0x1a8   : > { %v609_v14 = vadd.f32 %v605_v12, %v597_v10  ;;  %v607_v15 = vadd.f32 %v601_v13, %v595_v11 }
 0x1aa   : > { %614 = vst.msk [vmem:[%s1139_s0 + $0x18] sm:$0xff] %vm610_vm2, %v609_v14  ;;  %612 = vst.msk [vmem:[%s1139_s0 + $0x8] sm:$0xff] %vm610_vm2, %v607_v15 }
 0x1ab   : > { %v599_v18 = vpop.xlane.xlu0 %598  ;;  %v624_v19 = vpop.xlane.xlu1 %623 }
 0x1ac   : > { %v606_v20 = vadd.f32 %v599_v18, %v594_v16  ;;  %v631_v21 = vadd.f32 %v624_v19, %v615_v17 }
 0x1ae   : > { %611 = vst.msk [vmem:[%s1139_s0] sm:$0xff] %vm610_vm2, %v606_v20  ;;  %635 = vst.msk [vmem:[%s1144_s8] sm:$0xff] %vm610_vm2, %v631_v21 }
 0x1af   : > { %v603_v24 = vpop.xlane.xlu0 %602  ;;  %v628_v25 = vpop.xlane.xlu1 %627 }
 0x1b0   : > { %v608_v26 = vadd.f32 %v603_v24, %v596_v22  ;;  %v633_v27 = vadd.f32 %v628_v25, %v617_v23 }
 0x1b2   : > { %613 = vst.msk [vmem:[%s1139_s0 + $0x10] sm:$0xff] %vm610_vm2, %v608_v26  ;;  %637 = vst.msk [vmem:[%s1144_s8 + $0x10] sm:$0xff] %vm610_vm2, %v633_v27  ;;  %s867_s0 = sshll.u32 (%p1107_p6), %s1002_s27, 3 }
 0x1b3   : > { %v626_v29 = vpop.xlane.xlu0 %625  ;;  %s657_s21 = sadd.s32 (%p1107_p6), %s998_s26, %s867_s0 }
 0x1b4   : > { %v632_v30 = vadd.f32 %v626_v29, %v616_v28  ;;  %655 = sbr.rel (!%p1107_p6) target bundleno = 445 (0x1bd), region = 86  ;;  %s868_s24 = sshll.u32 (%p1107_p6), %s657_s21, 3 }
 0x1b6   : > { %636 = vst.msk [vmem:[%s1144_s8 + $0x8] sm:$0xff] %vm610_vm2, %v632_v30 }
 0x1b7   : > { %v630_v32 = vpop.xlane.xlu0 %629 }
 0x1b8   : > { %v634_v33 = vadd.f32 %v630_v32, %v618_v31 }
 0x1ba   : > { %638 = vst.msk [vmem:[%s1144_s8 + $0x18] sm:$0xff] %vm610_vm2, %v634_v33  ;;  %s659_s8 = scalar_lea.vmem (%p1107_p6), %s1264_s5, %s868_s24 }
 0x1bb   : > { %694 = vst [vmem:[%s659_s8] sm:$0xff] %v693_v34  ;;  %696 = vst [vmem:[%s659_s8 + $0x10] sm:$0xff] %v695_v35 }
 0x1bc   : > { %698 = vst [vmem:[%s659_s8 + $0x20] sm:$0xff] %v697_v36  ;;  %700 = vst [vmem:[%s659_s8 + $0x30] sm:$0xff] %v699_v37 }
 0x1bd PF: > { %s18_s30 = sadd.s32 1, %s1014_s30   ;;  %s1276_s27 = sld [smem:[#allocation4_spill]] }
 0x1be   : > { %p15_p1 = scmp.ge.s32.totalorder %s18_s30, 6   ;;  %s1277_s12 = sld [smem:[#allocation5_spill]] }
 0x1bf   : > { %s1278_s29 = sld [smem:[#allocation6_spill]]  ;;  %s1279_s24 = smov %s994_s25 }
 0x1c0   : > { %s1280_s25 = smov %s1115_s16  ;;  %s1281_s26 = smov %s1006_s28 }
 0x1c1   :  { %17 = sbr.rel (!%p15_p1) target bundleno = 6 (0x6), region = 182 }
 0x1c4   : > { %s1282_s28 = smov %s1277_s12 }

</bundles_post_ra>
